<compile_context>
chip_gen: v7x
topology: tpu7x:2x2x1
jax: 0.10.0
libtpu: 0.0.40
codegen_flags: <defaults>
</compile_context>

<pallas_src>
import functools

import jax
import jax.numpy as jnp
from jax.experimental import pallas as pl
from jax.experimental.pallas import tpu as pltpu


def _attention_kernel(x_ref, wq_ref, wk_ref, wv_ref, wout_ref, o_ref, acc_ref,
                      *, scale, compute_dtype, approx_recip):
    """One grid step = one (batch, head) pair.

    x_ref   : (1, N, D)         VMEM (resident across the heads axis)
    wq_ref  : (1, D, dh)        VMEM, this head's q projection
    wk_ref  : (1, D, dh)        VMEM, this head's k projection
    wv_ref  : (1, D, dh)        VMEM, this head's v projection
    wout_ref: (1, dh, D)        VMEM, this head's slice of the output projection
    o_ref   : (1, N, D)         VMEM output (written on the last head only)
    acc_ref : (N, D) float32    VMEM scratch accumulator over heads
    """
    h = pl.program_id(1)

    @pl.when(h == 0)
    def _init():
        acc_ref[...] = jnp.zeros_like(acc_ref)

    x = x_ref[0].astype(compute_dtype)        # (N, D)
    wq = wq_ref[0].astype(compute_dtype)      # (D, dh)
    wk = wk_ref[0].astype(compute_dtype)      # (D, dh)
    wv = wv_ref[0].astype(compute_dtype)      # (D, dh)

    # Per-head q/k/v projection, f32 accumulation. Scale folded into q
    # (O(N*dh) multiplies instead of scaling the (N, N) score tile).
    q = jnp.dot(x, wq, preferred_element_type=jnp.float32) * scale   # (N, dh) f32
    k = jnp.dot(x, wk, preferred_element_type=jnp.float32)           # (N, dh) f32
    v = jnp.dot(x, wv, preferred_element_type=jnp.float32)           # (N, dh) f32

    # q @ k^T without materializing the transpose (MXU consumes it directly).
    dots = jax.lax.dot_general(
        q.astype(compute_dtype), k.astype(compute_dtype),
        dimension_numbers=(((1,), (1,)), ((), ())),
        preferred_element_type=jnp.float32)                          # (N, N) f32

    # Softmax with deferred normalization (kept in f32).
    m = jnp.max(dots, axis=-1, keepdims=True)                        # (N, 1)
    e = jnp.exp(dots - m)                                            # (N, N) unnormalized
    s = jnp.sum(e, axis=-1, keepdims=True)                           # (N, 1)

    # (unnormalized probs) @ v, then normalize the small (N, dh) result.
    out_h = jnp.dot(e.astype(compute_dtype), v.astype(compute_dtype),
                    preferred_element_type=jnp.float32)              # (N, dh) f32
    out_h = out_h * pl.reciprocal(s, approx=approx_recip)

    # Per-head slice of the output projection, accumulated across heads.
    wout = wout_ref[0].astype(compute_dtype)                         # (dh, D)
    acc_ref[...] += jnp.dot(out_h.astype(compute_dtype), wout,
                            preferred_element_type=jnp.float32)      # (N, D)

    @pl.when(h == pl.num_programs(1) - 1)
    def _finalize():
        o_ref[0] = acc_ref[...].astype(o_ref.dtype)


def attention_pallas(x, w_qkv, w_out, *, heads, dim_head,
                     compute_dtype=None, approx_recip=True):
    """x: (B, N, D); w_qkv: (D, 3*heads*dim_head); w_out: (heads*dim_head, D).

    compute_dtype: dtype fed to the MXU (e.g. jnp.bfloat16); accumulation is
    always float32. Defaults to x.dtype.
    """
    B, N, D = x.shape
    inner = heads * dim_head
    assert w_qkv.shape == (D, 3 * inner)
    assert w_out.shape == (inner, D)
    scale = float(dim_head) ** -0.5
    if compute_dtype is None:
        compute_dtype = x.dtype

    # One-time layout plumbing in the wrapper: head-major weight blocks so the
    # kernel never does sub-lane slicing.
    wq, wk, wv = jnp.split(w_qkv, 3, axis=-1)                 # each (D, inner)

    def head_major(w):                                        # (D, inner)->(heads, D, dh)
        return w.reshape(D, heads, dim_head).transpose(1, 0, 2)

    wq, wk, wv = head_major(wq), head_major(wk), head_major(wv)
    w_out_h = w_out.reshape(heads, dim_head, D)               # (heads, dh, D)

    kernel = functools.partial(_attention_kernel,
                               scale=scale,
                               compute_dtype=compute_dtype,
                               approx_recip=approx_recip)

    return pl.pallas_call(
        kernel,
        out_shape=jax.ShapeDtypeStruct((B, N, D), x.dtype),
        grid_spec=pltpu.PrefetchScalarGridSpec(
            num_scalar_prefetch=0,
            grid=(B, heads),
            in_specs=[
                pl.BlockSpec((1, N, D), lambda b, h: (b, 0, 0)),          # x
                pl.BlockSpec((1, D, dim_head), lambda b, h: (h, 0, 0)),   # w_q[h]
                pl.BlockSpec((1, D, dim_head), lambda b, h: (h, 0, 0)),   # w_k[h]
                pl.BlockSpec((1, D, dim_head), lambda b, h: (h, 0, 0)),   # w_v[h]
                pl.BlockSpec((1, dim_head, D), lambda b, h: (h, 0, 0)),   # w_out[h]
            ],
            out_specs=pl.BlockSpec((1, N, D), lambda b, h: (b, 0, 0)),
            scratch_shapes=[pltpu.VMEM((N, D), jnp.float32)],
        ),
        compiler_params=pltpu.CompilerParams(
            # batch is parallel (megacore); heads carries the output accumulator.
            dimension_semantics=("parallel", "arbitrary"),
            vmem_limit_bytes=64 * 1024 * 1024),
    )(x, wq, wk, wv, w_out_h)


def attention_reference(x, w_qkv, w_out, *, heads, dim_head):
    """Pure-JAX reference matching the PyTorch forward exactly."""
    B, N, D = x.shape
    inner = heads * dim_head
    qkv = x @ w_qkv
    q, k, v = jnp.split(qkv, 3, axis=-1)

    def to_heads(t):  # 'b n (h d) -> b h n d'
        return t.reshape(B, N, heads, dim_head).transpose(0, 2, 1, 3)

    q, k, v = to_heads(q), to_heads(k), to_heads(v)
    dots = jnp.einsum('bhnd,bhmd->bhnm', q, k) * (float(dim_head) ** -0.5)
    attn = jax.nn.softmax(dots, axis=-1)
    out = jnp.einsum('bhnm,bhmd->bhnd', attn, v)
    out = out.transpose(0, 2, 1, 3).reshape(B, N, inner)  # 'b h n d -> b n (h d)'
    return out @ w_out


if __name__ == "__main__":
    # Small shapes consistent with the module's forward.
    B, N, D = 2, 8, 32          # batch, tokens, dim
    heads, dim_head = 4, 8      # inner_dim = 32; project_out == True
    inner = heads * dim_head

    key = jax.random.PRNGKey(0)
    kx, kqkv, kout = jax.random.split(key, 3)

    x = jax.random.normal(kx, (B, N, D), dtype=jnp.float32)
    # Deterministic parameter init (Linear weights, stored as (in, out)).
    w_qkv = jax.random.normal(kqkv, (D, 3 * inner), dtype=jnp.float32) * (D ** -0.5)
    w_out = jax.random.normal(kout, (inner, D), dtype=jnp.float32) * (inner ** -0.5)

    ref = attention_reference(x, w_qkv, w_out, heads=heads, dim_head=dim_head)

    # 1) Full-precision path (exact reciprocal) — tight check vs reference.
    out = attention_pallas(x, w_qkv, w_out, heads=heads, dim_head=dim_head,
                           approx_recip=False)
    out = jax.block_until_ready(out)
    assert out.shape == (B, N, D)
    assert jnp.allclose(out, ref, atol=1e-4, rtol=1e-4), "f32 mismatch vs reference"

    # 2) Optimized path: bf16 MXU inputs (f32 accumulation) + approx reciprocal.
    out_fast = attention_pallas(x, w_qkv, w_out, heads=heads, dim_head=dim_head,
                                compute_dtype=jnp.bfloat16, approx_recip=True)
    out_fast = jax.block_until_ready(out_fast)
    assert out_fast.shape == (B, N, D)
    assert jnp.allclose(out_fast, ref, atol=2e-1, rtol=2e-1), "bf16 mismatch vs reference"

    print("KERNEL_OK")
</pallas_src>

<mosaic_0001>
module attributes {stable_mosaic.version = 11 : i64} {
  func.func @_attention_kernel(%arg0: i32, %arg1: i32, %arg2: memref<1x8x32xf32, #tpu.memory_space<vmem>>, %arg3: memref<1x32x8xf32, #tpu.memory_space<vmem>>, %arg4: memref<1x32x8xf32, #tpu.memory_space<vmem>>, %arg5: memref<1x32x8xf32, #tpu.memory_space<vmem>>, %arg6: memref<1x8x32xf32, #tpu.memory_space<vmem>>, %arg7: memref<1x8x32xf32, #tpu.memory_space<vmem>>, %arg8: memref<8x32xf32, #tpu.memory_space<vmem>>) attributes {dimension_semantics = [#tpu.dimension_semantics<parallel>, #tpu.dimension_semantics<arbitrary>], iteration_bounds = array<i64: 2, 4>, scalar_prefetch = 0 : i64, scratch_operands = 1 : i64, tpu.core_type = #tpu.core_type<tc>, window_params = [{transform_indices = @transform_0, window_bounds = array<i64: 1, 8, 32>}, {transform_indices = @transform_1, window_bounds = array<i64: 1, 32, 8>}, {transform_indices = @transform_2, window_bounds = array<i64: 1, 32, 8>}, {transform_indices = @transform_3, window_bounds = array<i64: 1, 32, 8>}, {transform_indices = @transform_4, window_bounds = array<i64: 1, 8, 32>}, {transform_indices = @transform_5, window_bounds = array<i64: 1, 8, 32>}]} {
    %c0_i32 = arith.constant 0 : i32
    %0 = arith.cmpi eq, %arg1, %c0_i32 : i32
    %1 = arith.extui %0 : i1 to i32
    %c0_i32_0 = arith.constant 0 : i32
    %2 = arith.cmpi ne, %1, %c0_i32_0 : i32
    scf.if %2 {
      %cst_28 = arith.constant 0.000000e+00 : f32
      %37 = vector.broadcast %cst_28 : f32 to vector<8x32xf32>
      %c0_29 = arith.constant 0 : index
      %c0_30 = arith.constant 0 : index
      %38 = vector.load %arg8[%c0_29, %c0_30] : memref<8x32xf32, #tpu.memory_space<vmem>>, vector<8x32xf32>
      tpu.vector_store %arg8[%c0_29, %c0_30], %37 {strides = array<i32>} : memref<8x32xf32, #tpu.memory_space<vmem>>, vector<8x32xf32>,
    } else {
    }
    %c0 = arith.constant 0 : index
    %c0_1 = arith.constant 0 : index
    %c0_2 = arith.constant 0 : index
    %3 = vector.load %arg2[%c0, %c0_1, %c0_2] : memref<1x8x32xf32, #tpu.memory_space<vmem>>, vector<1x8x32xf32>
    %4 = vector.shape_cast %3 : vector<1x8x32xf32> to vector<8x32xf32>
    %c0_3 = arith.constant 0 : index
    %c0_4 = arith.constant 0 : index
    %c0_5 = arith.constant 0 : index
    %5 = vector.load %arg3[%c0_3, %c0_4, %c0_5] : memref<1x32x8xf32, #tpu.memory_space<vmem>>, vector<1x32x8xf32>
    %6 = vector.shape_cast %5 : vector<1x32x8xf32> to vector<32x8xf32>
    %c0_6 = arith.constant 0 : index
    %c0_7 = arith.constant 0 : index
    %c0_8 = arith.constant 0 : index
    %7 = vector.load %arg4[%c0_6, %c0_7, %c0_8] : memref<1x32x8xf32, #tpu.memory_space<vmem>>, vector<1x32x8xf32>
    %8 = vector.shape_cast %7 : vector<1x32x8xf32> to vector<32x8xf32>
    %c0_9 = arith.constant 0 : index
    %c0_10 = arith.constant 0 : index
    %c0_11 = arith.constant 0 : index
    %9 = vector.load %arg5[%c0_9, %c0_10, %c0_11] : memref<1x32x8xf32, #tpu.memory_space<vmem>>, vector<1x32x8xf32>
    %10 = vector.shape_cast %9 : vector<1x32x8xf32> to vector<32x8xf32>
    %cst = arith.constant dense<0.000000e+00> : vector<8x8xf32>
    %11 = tpu.matmul %4, %6, %cst {dimension_numbers = #tpu.dot_dimension_numbers<[1], [0], [0], [1], [0, 0, 1, 1], [], []>} : vector<8x32xf32>, vector<32x8xf32>, vector<8x8xf32> -> vector<8x8xf32>
    %cst_12 = arith.constant 0.353553385 : f32
    %12 = vector.broadcast %cst_12 : f32 to vector<8x8xf32>
    %13 = arith.mulf %11, %12 : vector<8x8xf32>
    %cst_13 = arith.constant dense<0.000000e+00> : vector<8x8xf32>
    %14 = tpu.matmul %4, %8, %cst_13 {dimension_numbers = #tpu.dot_dimension_numbers<[1], [0], [0], [1], [0, 0, 1, 1], [], []>} : vector<8x32xf32>, vector<32x8xf32>, vector<8x8xf32> -> vector<8x8xf32>
    %cst_14 = arith.constant dense<0.000000e+00> : vector<8x8xf32>
    %15 = tpu.matmul %4, %10, %cst_14 {dimension_numbers = #tpu.dot_dimension_numbers<[1], [0], [0], [1], [0, 0, 1, 1], [], []>} : vector<8x32xf32>, vector<32x8xf32>, vector<8x8xf32> -> vector<8x8xf32>
    %cst_15 = arith.constant dense<0.000000e+00> : vector<8x8xf32>
    %16 = tpu.matmul %13, %14, %cst_15 {dimension_numbers = #tpu.dot_dimension_numbers<[1], [1], [0], [0], [0, 0, 1, 0], [], []>} : vector<8x8xf32>, vector<8x8xf32>, vector<8x8xf32> -> vector<8x8xf32>
    %cst_16 = arith.constant dense<0xFF800000> : vector<8xf32>
    %17 = vector.multi_reduction <maximumf>, %16, %cst_16 [1] : vector<8x8xf32> to vector<8xf32>
    %18 = vector.shape_cast %17 : vector<8xf32> to vector<8x1xf32>
    %19 = vector.broadcast %18 : vector<8x1xf32> to vector<8x8xf32>
    %20 = arith.subf %16, %19 : vector<8x8xf32>
    %21 = math.exp %20 : vector<8x8xf32>
    %cst_17 = arith.constant dense<0.000000e+00> : vector<8xf32>
    %22 = vector.multi_reduction <add>, %21, %cst_17 [1] : vector<8x8xf32> to vector<8xf32>
    %23 = vector.shape_cast %22 : vector<8xf32> to vector<8x1xf32>
    %cst_18 = arith.constant dense<0.000000e+00> : vector<8x8xf32>
    %24 = tpu.matmul %21, %15, %cst_18 {dimension_numbers = #tpu.dot_dimension_numbers<[1], [0], [0], [1], [0, 0, 1, 1], [], []>} : vector<8x8xf32>, vector<8x8xf32>, vector<8x8xf32> -> vector<8x8xf32>
    %25 = tpu.reciprocal %23 : vector<8x1xf32> -> vector<8x1xf32>
    %26 = vector.broadcast %25 : vector<8x1xf32> to vector<8x8xf32>
    %27 = arith.mulf %24, %26 : vector<8x8xf32>
    %c0_19 = arith.constant 0 : index
    %c0_20 = arith.constant 0 : index
    %c0_21 = arith.constant 0 : index
    %28 = vector.load %arg6[%c0_19, %c0_20, %c0_21] : memref<1x8x32xf32, #tpu.memory_space<vmem>>, vector<1x8x32xf32>
    %29 = vector.shape_cast %28 : vector<1x8x32xf32> to vector<8x32xf32>
    %c0_22 = arith.constant 0 : index
    %c0_23 = arith.constant 0 : index
    %30 = vector.load %arg8[%c0_22, %c0_23] : memref<8x32xf32, #tpu.memory_space<vmem>>, vector<8x32xf32>
    %cst_24 = arith.constant dense<0.000000e+00> : vector<8x32xf32>
    %31 = tpu.matmul %27, %29, %cst_24 {dimension_numbers = #tpu.dot_dimension_numbers<[1], [0], [0], [1], [0, 0, 1, 1], [], []>} : vector<8x8xf32>, vector<8x32xf32>, vector<8x32xf32> -> vector<8x32xf32>
    %32 = arith.addf %30, %31 : vector<8x32xf32>
    %c0_25 = arith.constant 0 : index
    %c0_26 = arith.constant 0 : index
    %33 = vector.load %arg8[%c0_25, %c0_26] : memref<8x32xf32, #tpu.memory_space<vmem>>, vector<8x32xf32>
    tpu.vector_store %arg8[%c0_25, %c0_26], %32 {strides = array<i32>} : memref<8x32xf32, #tpu.memory_space<vmem>>, vector<8x32xf32>,
    %c3_i32 = arith.constant 3 : i32
    %34 = arith.cmpi eq, %arg1, %c3_i32 : i32
    %35 = arith.extui %34 : i1 to i32
    %c0_i32_27 = arith.constant 0 : i32
    %36 = arith.cmpi ne, %35, %c0_i32_27 : i32
    scf.if %36 {
      %c0_28 = arith.constant 0 : index
      %c0_29 = arith.constant 0 : index
      %37 = vector.load %arg8[%c0_28, %c0_29] : memref<8x32xf32, #tpu.memory_space<vmem>>, vector<8x32xf32>
      %c0_30 = arith.constant 0 : index
      %c0_31 = arith.constant 0 : index
      %c0_32 = arith.constant 0 : index
      %38 = vector.load %arg7[%c0_30, %c0_31, %c0_32] : memref<1x8x32xf32, #tpu.memory_space<vmem>>, vector<1x8x32xf32>
      %39 = vector.shape_cast %38 : vector<1x8x32xf32> to vector<8x32xf32>
      %40 = vector.shape_cast %37 : vector<8x32xf32> to vector<1x8x32xf32>
      tpu.vector_store %arg7[%c0_30, %c0_31, %c0_32], %40 {strides = array<i32>} : memref<1x8x32xf32, #tpu.memory_space<vmem>>, vector<1x8x32xf32>,
    } else {
    }
    return
  }
  func.func @transform_0(%arg0: i32, %arg1: i32) -> (i32, i32, i32) {
    %c0_i32 = arith.constant 0 : i32
    %c0_i32_0 = arith.constant 0 : i32
    %c0_i32_1 = arith.constant 0 : i32
    return %arg0, %c0_i32, %c0_i32_0 : i32, i32, i32
  }
  func.func @transform_1(%arg0: i32, %arg1: i32) -> (i32, i32, i32) {
    %c0_i32 = arith.constant 0 : i32
    %c0_i32_0 = arith.constant 0 : i32
    %c0_i32_1 = arith.constant 0 : i32
    return %arg1, %c0_i32, %c0_i32_0 : i32, i32, i32
  }
  func.func @transform_2(%arg0: i32, %arg1: i32) -> (i32, i32, i32) {
    %c0_i32 = arith.constant 0 : i32
    %c0_i32_0 = arith.constant 0 : i32
    %c0_i32_1 = arith.constant 0 : i32
    return %arg1, %c0_i32, %c0_i32_0 : i32, i32, i32
  }
  func.func @transform_3(%arg0: i32, %arg1: i32) -> (i32, i32, i32) {
    %c0_i32 = arith.constant 0 : i32
    %c0_i32_0 = arith.constant 0 : i32
    %c0_i32_1 = arith.constant 0 : i32
    return %arg1, %c0_i32, %c0_i32_0 : i32, i32, i32
  }
  func.func @transform_4(%arg0: i32, %arg1: i32) -> (i32, i32, i32) {
    %c0_i32 = arith.constant 0 : i32
    %c0_i32_0 = arith.constant 0 : i32
    %c0_i32_1 = arith.constant 0 : i32
    return %arg1, %c0_i32, %c0_i32_0 : i32, i32, i32
  }
  func.func @transform_5(%arg0: i32, %arg1: i32) -> (i32, i32, i32) {
    %c0_i32 = arith.constant 0 : i32
    %c0_i32_0 = arith.constant 0 : i32
    %c0_i32_1 = arith.constant 0 : i32
    return %arg0, %c0_i32, %c0_i32_0 : i32, i32, i32
  }
}

</mosaic_0001>

<bundles_post_ra>
// kernel: tpu_custom_call.1
= control target key start
LH: loop header
LB: loop body
LE: loop exit
PB: predicated region body
PF: predicated region fallthrough
CT: control target
= control target key end

     0   :  { %s2102_s0 = inlined_call_operand.hbm [shape: f32[2,8,32], index: 0, kind: input, shape index: {}]   ;;  %s2103_s1 = inlined_call_operand.hbm [shape: f32[4,32,8], index: 1, kind: input, shape index: {}]   ;;  %s2104_s2 = inlined_call_operand.hbm [shape: f32[4,32,8], index: 2, kind: input, shape index: {}]   ;;  %s2105_s3 = inlined_call_operand.hbm [shape: f32[4,32,8], index: 3, kind: input, shape index: {}]   ;;  %s2106_s4 = inlined_call_operand.hbm [shape: f32[4,8,32], index: 4, kind: input, shape index: {}]   ;;  %s2107_s5 = inlined_call_operand.hbm [shape: f32[2,8,32], index: 5, kind: output, shape index: {}]  }
   0x1   :  { %2133 = sst [smem:[#allocation30_spill]] %s2103_s1 }
   0x2   :  { %2134 = sst [smem:[#allocation31_spill]] %s2105_s3 }
   0x3   :  { %2135 = sst [smem:[#allocation32_spill]] %s2107_s5 }
   0x4   :  { %10 = vsyncpa [#allocation4], 0 }
   0x5   :  { %12 = vsyncpa [#allocation4 + $0x1], 0 }
   0x6   :  { %13 = vsyncpa [#allocation7], 0 }
   0x7   :  { %15 = vsyncpa [#allocation7 + $0x1], 0 }
   0x8   :  { %16 = vsyncpa [#allocation10], 0 }
   0x9   :  { %18 = vsyncpa [#allocation10 + $0x1], 0 }
   0xa   :  { %19 = vsyncpa [#allocation5], 0 }
   0xb   :  { %21 = vsyncpa [#allocation5 + $0x1], 0  ;;  %s1645_s18 = smov 0   ;;  %s1647_s19 = smov 0  }
   0xc   :  { %s1649_s20 = smov 0   ;;  %s1651_s21 = smov 0  }
   0xd   :  { %s1653_s22 = smov 0   ;;  %s1655_s23 = smov 0  }
   0xe   :  { %s1657_s24 = smov 0   ;;  %s1659_s25 = smov 0  }
   0xf   :  { %s1661_s26 = smov 0   ;;  %s1663_s27 = smov 0  }
  0x10   :  { %s1665_s28 = smov 0  }
  0x11 LB: > { %2136 = sst [smem:[#allocation17_spill]] %s1565_s19  ;;  %p2111_p0 = scmp.eq.s32.totalorder %s1601_s28, 0  ;;  %s1601_s28 = sphi %s1665_s28, %s27_s28   ;;  %s1597_s27 = sphi %s1663_s27, %s2190_s27   ;;  %s1593_s26 = sphi %s1661_s26, %s2196_s26   ;;  %s1589_s25 = sphi %s1659_s25, %s2188_s25   ;;  %s1585_s24 = sphi %s1657_s24, %s2195_s24   ;;  %s1581_s23 = sphi %s1655_s23, %s2187_s23   ;;  %s1577_s22 = sphi %s1653_s22, %s2194_s22   ;;  %s1573_s21 = sphi %s1651_s21, %s2193_s21   ;;  %s1569_s20 = sphi %s1649_s20, %s2192_s20   ;;  %s1565_s19 = sphi %s1647_s19, %s2191_s19   ;;  %s1561_s18 = sphi %s1645_s18, %s2184_s18  }
  0x12   : > { %2137 = sst [smem:[#allocation18_spill]] %s1581_s23  ;;  %p79_p1 = scmp.ne.s32.totalorder %s1569_s20, %s1565_s19 }
  0x13   : > { %2138 = sst [smem:[#allocation19_spill]] %s1585_s24  ;;  %p2110_p2 = scmp.lt.s32.totalorder %s1601_s28, 8 }
  0x14   : > { %2139 = sst [smem:[#allocation20_spill]] %s1589_s25  ;;  %s2109_s30 = sand.u32 1, %s1601_s28  }
  0x15   : > { %2140 = sst [smem:[#allocation21_spill]] %s1597_s27  ;;  %p81_p3 = por %p79_p1, %p2111_p0 }
  0x16   : > { %s2108_s6 = sand.u32 1, %s1569_s20   ;;  %s1710_s7 = sshll.u32 %s1593_s26, 9 }
  0x17   : > { %s1714_s8 = sshll.u32 %s2108_s6, 5  ;;  %s2141_s1 = sld [smem:[#allocation30_spill]] }
  0x18   : > { %p1724_p4 = pnand %p2110_p2, %p81_p3  ;;  %s235_s13 = scalar_lea.vmem [#allocation6], %s1714_s8 }
  0x19   : > { %s242_s14 = sshll.u32 %s235_s13, 4  ;;  %s1734_s15 = scalar_lea.sflag [#allocation7], %s2109_s30  ;;  %s1729_s14 = int_to_ptr.vmem [resolvable:$true] %s242_s14 }
  0x1a   : > { %s2142_s12 = scalar_select %p1724_p4, 1, 0 }
  0x1b   : > { %p1740_p7 = pneg %p1724_p4 }
  0x1d   : > { %s1720_s11 = scalar_lea.hbm %s2141_s1, %s1710_s7  ;;  %s1326_s13 = scalar_lea.hbm %s2141_s1, 2048 }
  0x1e   : > { %s1321_s16 = scalar_lea.hbm %s1720_s11, 512  ;;  %p1327_p10 = scmp.lt.u32.totalorder %s1720_s11, %s2141_s1 }
  0x1f   : > { %p1322_p6 = scmp.ne.s32.totalorder %s1720_s11, %s1321_s16  ;;  %p1328_p11 = scmp.lt.u32.totalorder %s1326_s13, %s1321_s16 }
  0x20   : > { %p1330_p13 = scmp.lt.u32.totalorder %s1321_s16, %s1720_s11 }
  0x21   : > { %p1324_p8 = pnand %p1740_p7, %p1322_p6  ;;  %p1329_p12 = por %p1328_p11, %p1327_p10 }
  0x23   : > { %p1325_p9 = pneg %p1324_p8  ;;  %p1331_p1 = por %p1330_p13, %p1329_p12 }
  0x25   : > { %p1332_p3 = pnand %p1331_p1, %p1325_p9 }
  0x27   : > { %1335 = shalt.err (!%p1332_p3)
}
  0x28   : > { %s1336_s30 = scalar_lea.vmem %s1729_s14, 512  ;;  %s1603_s9 = smov [#allocation6]  }
  0x29   : > { %p1337_p6 = scmp.ne.s32.totalorder %s1729_s14, %s1336_s30  ;;  %s1341_s10 = sshll.u32 %s1603_s9, 4  ;;  %s1342_s10 = int_to_ptr.vmem [resolvable:$false] %s1341_s10 }
  0x2a   : > { %s1343_s29 = scalar_lea.vmem %s1342_s10, 1024  ;;  %p1344_p0 = scmp.lt.s32.totalorder %s1729_s14, %s1342_s10 }
  0x2b   : > { %p1339_p8 = pnand %p1337_p6, %p1740_p7  ;;  %p1345_p5 = scmp.lt.s32.totalorder %s1343_s29, %s1336_s30 }
  0x2d   : > { %p1340_p2 = pneg %p1339_p8  ;;  %p1346_p10 = por %p1345_p5, %p1344_p0 }
  0x2f   : > { %p1347_p11 = pnand %p1346_p10, %p1340_p2 }
  0x31   : > { %1350 = shalt.err (!%p1347_p11)
}
  0x32   : > { %s2112_s6 = smov 128   ;;  %s2114_s16 = smov 8  }
  0x33   : > { %1207 = dma.hbm_to_vmem [thread:$0]  (!%p1724_p4), %s1720_s11, 512, %s1729_s14, %s1734_s15, %s2112_s6, %s2112_s6, %s2114_s16  }
  0x34   : > { %p310_p0 = scmp.lt.s32.totalorder %s1601_s28, 9  ;;  %s2144_s3 = sld [smem:[#allocation31_spill]] }
  0x35   : > { %p2145_p2 = scmp.ge.s32.totalorder %s1601_s28, 1  ;;  %s277_s29 = scalar_lea.vmem [#allocation9], %s1714_s8 }
  0x36   : > { %s284_s1 = sshll.u32 %s277_s29, 4  ;;  %s2148_s11 = sand.u32 1, %s1601_s28   ;;  %s1781_s1 = int_to_ptr.vmem [resolvable:$true] %s284_s1 }
  0x37   : > { %p1776_p5 = pnand %p2145_p2, %p310_p0  ;;  %s1785_s14 = scalar_lea.sflag [#allocation10], %s2148_s11 }
  0x39   : > { %s2146_s10 = scalar_select %p1776_p5, 1, 0 }
  0x3a   : > { %s1772_s9 = scalar_lea.hbm %s2144_s3, %s1710_s7  ;;  %s1356_s16 = scalar_lea.hbm %s2144_s3, 2048 }
  0x3b   : > { %2147 = sst [smem:[#allocation22_spill]] %s2146_s10  ;;  %s1351_s6 = scalar_lea.hbm %s1772_s9, 512 }
  0x3c   : > { %p1352_p9 = scmp.ne.s32.totalorder %s1772_s9, %s1351_s6  ;;  %p1357_p1 = scmp.lt.u32.totalorder %s1772_s9, %s2144_s3 }
  0x3d   : > { %p1358_p3 = scmp.lt.u32.totalorder %s1356_s16, %s1351_s6  ;;  %p1360_p8 = scmp.lt.u32.totalorder %s1351_s6, %s1772_s9 }
  0x3e   : > { %p1354_p12 = pnand %p1352_p9, %p1740_p7 }
  0x3f   : > { %p1359_p6 = por %p1358_p3, %p1357_p1 }
  0x40   : > { %p1355_p13 = pneg %p1354_p12 }
  0x41   : > { %p1361_p10 = por %p1360_p8, %p1359_p6 }
  0x43   : > { %p1362_p11 = pnand %p1361_p10, %p1355_p13 }
  0x45   : > { %1365 = shalt.err (!%p1362_p11)
}
  0x46   : > { %s1366_s29 = scalar_lea.vmem %s1781_s1, 512  ;;  %s1606_s11 = smov [#allocation9]  }
  0x47   : > { %p1367_p0 = scmp.ne.s32.totalorder %s1781_s1, %s1366_s29  ;;  %s1371_s30 = sshll.u32 %s1606_s11, 4  ;;  %s1372_s30 = int_to_ptr.vmem [resolvable:$false] %s1371_s30 }
  0x48   : > { %s1373_s5 = scalar_lea.vmem %s1372_s30, 1024  ;;  %p1374_p12 = scmp.lt.s32.totalorder %s1781_s1, %s1372_s30 }
  0x49   : > { %p1369_p2 = pnand %p1367_p0, %p1740_p7  ;;  %p1375_p5 = scmp.lt.s32.totalorder %s1373_s5, %s1366_s29 }
  0x4b   : > { %p1370_p9 = pneg %p1369_p2  ;;  %p1376_p1 = por %p1375_p5, %p1374_p12 }
  0x4d   : > { %p1377_p3 = pnand %p1376_p1, %p1370_p9 }
  0x4f   : > { %1380 = shalt.err (!%p1377_p3)
}
  0x50   : > { %s2149_s25 = smov 8   ;;  %s2150_s6 = smov 128  }
  0x51   : > { %1213 = dma.hbm_to_vmem [thread:$0]  (!%p1724_p4), %s1772_s9, 512, %s1781_s1, %s1785_s14, %s2150_s6, %s2150_s6, %s2149_s25  }
  0x52   : > { %s1813_s16 = sadd.s32 4294967295, %s1601_s28   ;;  %s1063_s13 = sadd.s32 4294967294, %s1601_s28  }
  0x53   : > { %2151 = sst [smem:[#allocation23_spill]] %s1813_s16  ;;  %s36_s29 = sadd.s32 1, %s1593_s26 }
  0x54   : > { %p37_p5 = scmp.ge.s32.totalorder %s36_s29, 4  ;;  %s39_s11 = sadd.s32 1, %s1597_s27 }
  0x55   : > { %s46_s30 = sadd.s32 1, %s1581_s23  ;;  %p53_p13 = scmp.ne.s32.totalorder %s1581_s23, %s1577_s22 }
  0x56   : > { %s2198_s29 = smov (%p37_p5, %s36_s29), 0  ;;  %s2200_s11 = smov (!%p37_p5, %s39_s11), %s1597_s27 }
  0x57   : > { %2152 = sst [smem:[#allocation24_spill]] %s2198_s29  ;;  %p2153_p6 = scmp.eq.s32.totalorder %s1601_s28, 0 }
  0x58   : > { %p59_p10 = scmp.ne.s32.totalorder %s1577_s22, %s1573_s21  ;;  %p41_p11 = scmp.ge.s32.totalorder %s2200_s11, 2 }
  0x59   : > { %p1829_p8 = por %p2153_p6, %p53_p13  ;;  %p60_p0 = scmp.eq.s32.totalorder %s1813_s16, 0 }
  0x5a   : > { %s69_s9 = ssub.s32 %s1593_s26, %s2198_s29  ;;  %p85_p2 = scmp.ne.s32.totalorder %s1565_s19, %s1561_s18 }
  0x5b   : > { %s2202_s11 = smov (%p41_p11, %s2200_s11), 0  ;;  %p1845_p9 = por %p60_p0, %p59_p10 }
  0x5c   : > { %2155 = sst [smem:[#allocation25_spill]] %s2202_s11  ;;  %p70_p12 = scmp.eq.s32.totalorder %s69_s9, 0 }
  0x5d   : > { %s2156_s5 = scalar_select %p1845_p9, 1, 0 }
  0x5e   : > { %s43_s3 = ssub.s32 %s1597_s27, %s2202_s11  ;;  %p1851_p1 = por %p85_p2, %p60_p0 }
  0x5f   : > { %2157 = sst [smem:[#allocation26_spill]] %s2156_s5  ;;  %p44_p3 = scmp.eq.s32.totalorder %s43_s3, 0 }
  0x60   : > { %s2158_s24 = scalar_select %p1851_p1, 1, 0 }
  0x61   : > { %p187_p5 = scmp.eq.s32.totalorder %s1813_s16, 7  ;;  %s2160_s29 = sadd.s32 1, %s1569_s20 }
  0x62   : > { %2159 = sst [smem:[#allocation27_spill]] %s2158_s24  ;;  %p193_p11 = scmp.eq.s32.totalorder %s1063_s13, 7 }
  0x63   : > { %s1859_s18 = scalar_select %p70_p12, %s1569_s20, %s2160_s29  }
  0x64   : > { %s1862_s19 = scalar_select %p44_p3, %s1581_s23, %s46_s30  }
  0x65   : > { %2161 = sst [smem:[#allocation28_spill]] %s1859_s18  ;;  %p1867_p6 = por %p187_p5, %p53_p13 }
  0x66   : > { %2162 = sst [smem:[#allocation29_spill]] %s1862_s19  ;;  %s213_s5 = sand.u32 1, %s1581_s23  }
  0x67   : > { %s2163_s10 = scalar_select %p1867_p6, 1, 0 }
  0x68   : > { %s1067_s9 = sshll.u32 %s1597_s27, 7  ;;  %p1876_p0 = por %p193_p11, %p59_p10 }
  0x69   : > { %s1066_s3 = sshll.u32 %s213_s5, 3  ;;  %s1883_s29 = scalar_lea.hbm %s2102_s0, %s1067_s9 }
  0x6a   : > { %s2164_s11 = scalar_select %p1876_p0, 1, 0 }
  0x6b   : > { %p2165_p2 = scmp.lt.s32.totalorder %s1601_s28, 8  ;;  %s217_s30 = scalar_lea.vmem [#allocation3], %s1066_s3 }
  0x6c   : > { %s224_s27 = sshll.u32 %s217_s30, 4  ;;  %s214_s19 = scalar_lea.sflag [#allocation4], %s213_s5  ;;  %s1893_s27 = int_to_ptr.vmem [resolvable:$true] %s224_s27 }
  0x6d   : > { %p1889_p13 = pnand %p2165_p2, %p1829_p8  ;;  %s1381_s24 = scalar_lea.hbm %s1883_s29, 128 }
  0x6e   : > { %p1382_p10 = scmp.ne.s32.totalorder %s1883_s29, %s1381_s24  ;;  %s1386_s9 = scalar_lea.hbm %s2102_s0, 256 }
  0x6f   : > { %p1383_p12 = pneg %p1889_p13  ;;  %p1387_p8 = scmp.lt.u32.totalorder %s1883_s29, %s2102_s0 }
  0x70   : > { %p1388_p11 = scmp.lt.u32.totalorder %s1386_s9, %s1381_s24  ;;  %p1390_p0 = scmp.lt.u32.totalorder %s1381_s24, %s1883_s29 }
  0x71   : > { %p1384_p3 = pnand %p1383_p12, %p1382_p10 }
  0x72   : > { %p1389_p2 = por %p1388_p11, %p1387_p8 }
  0x73   : > { %p1385_p5 = pneg %p1384_p3 }
  0x74   : > { %p1391_p6 = por %p1390_p0, %p1389_p2 }
  0x76   : > { %p1392_p1 = pnand %p1391_p6, %p1385_p5 }
  0x78   : > { %1395 = shalt.err (!%p1392_p1)
}
  0x79   : > { %s1396_s5 = scalar_lea.vmem %s1893_s27, 128  ;;  %s1607_s3 = smov [#allocation3]  }
  0x7a   : > { %p1397_p10 = scmp.ne.s32.totalorder %s1893_s27, %s1396_s5  ;;  %s1401_s30 = sshll.u32 %s1607_s3, 4  ;;  %s1402_s30 = int_to_ptr.vmem [resolvable:$false] %s1401_s30 }
  0x7b   : > { %s1403_s23 = scalar_lea.vmem %s1402_s30, 256  ;;  %p1404_p4 = scmp.lt.s32.totalorder %s1893_s27, %s1402_s30 }
  0x7c   : > { %p1399_p3 = pnand %p1397_p10, %p1383_p12  ;;  %p1405_p8 = scmp.lt.s32.totalorder %s1403_s23, %s1396_s5 }
  0x7e   : > { %p1400_p9 = pneg %p1399_p3  ;;  %p1406_p11 = por %p1405_p8, %p1404_p4 }
  0x80   : > { %p1407_p0 = pnand %p1406_p11, %p1400_p9 }
  0x82   : > { %1410 = shalt.err (!%p1407_p0)
}
  0x83   : > { %1204 = dma.hbm_to_vmem [thread:$0]  (!%p1889_p13), %s1883_s29, 128, %s1893_s27, %s214_s19  }
  0x84   : > { %s1924_s16 = scalar_lea.hbm %s2104_s2, %s1710_s7  ;;  %s256_s1 = scalar_lea.vmem [#allocation8], %s1714_s8 }
  0x85   : > { %s263_s9 = sshll.u32 %s256_s1, 4  ;;  %s2167_s13 = sand.u32 1, %s1569_s20   ;;  %s1927_s9 = int_to_ptr.vmem [resolvable:$true] %s263_s9 }
  0x86   : > { %s1931_s5 = sshll.u32 %s2167_s13, 3  ;;  %s1411_s3 = scalar_lea.hbm %s1924_s16, 512 }
  0x87   : > { %p1412_p4 = scmp.ne.s32.totalorder %s1924_s16, %s1411_s3  ;;  %s1416_s7 = scalar_lea.hbm %s2104_s2, 2048 }
  0x88   : > { %p1417_p6 = scmp.lt.u32.totalorder %s1924_s16, %s2104_s2  ;;  %p1418_p13 = scmp.lt.u32.totalorder %s1416_s7, %s1411_s3 }
  0x89   : > { %p1414_p9 = pnand %p1412_p4, %p1740_p7  ;;  %p1420_p5 = scmp.lt.u32.totalorder %s1411_s3, %s1924_s16 }
  0x8a   : > { %p1419_p12 = por %p1418_p13, %p1417_p6 }
  0x8b   : > { %p1415_p1 = pneg %p1414_p9 }
  0x8c   : > { %p1421_p2 = por %p1420_p5, %p1419_p12 }
  0x8e   : > { %p1422_p10 = pnand %p1421_p2, %p1415_p1 }
  0x90   : > { %1425 = shalt.err (!%p1422_p10)
}
  0x91   : > { %s1426_s8 = scalar_lea.vmem %s1927_s9, 512  ;;  %s1608_s23 = smov [#allocation8]  }
  0x92   : > { %p1427_p3 = scmp.ne.s32.totalorder %s1927_s9, %s1426_s8  ;;  %s1431_s18 = sshll.u32 %s1608_s23, 4  ;;  %s1432_s18 = int_to_ptr.vmem [resolvable:$false] %s1431_s18 }
  0x93   : > { %s1433_s24 = scalar_lea.vmem %s1432_s18, 1024  ;;  %p1434_p0 = scmp.lt.s32.totalorder %s1927_s9, %s1432_s18 }
  0x94   : > { %p1429_p8 = pnand %p1427_p3, %p1740_p7  ;;  %p1435_p4 = scmp.lt.s32.totalorder %s1433_s24, %s1426_s8 }
  0x96   : > { %p1430_p11 = pneg %p1429_p8  ;;  %p1436_p9 = por %p1435_p4, %p1434_p0 }
  0x98   : > { %p1437_p6 = pnand %p1436_p9, %p1430_p11 }
  0x9a   : > { %1440 = shalt.err (!%p1437_p6)
}
  0x9b   : > { %p2168_p1 = scmp.ne.s32.totalorder %s2142_s12, 0  ;;  %s1078_s1 = sshll.u32 %s1593_s26, 7 }
  0x9c   : > { %s1962_s19 = scalar_lea.hbm %s2106_s4, %s1078_s1  ;;  %s298_s27 = scalar_lea.vmem [#allocation11], %s1931_s5 }
  0x9d   : > { %1210 = dma.hbm_to_vmem [thread:$0]  (!%p2168_p1), %s1924_s16, 512, %s1927_s9, %s1734_s15, %s2150_s6, %s2150_s6, %s2149_s25  }
  0x9e   : > { %s305_s7 = sshll.u32 %s298_s27, 4  ;;  %s1441_s29 = scalar_lea.hbm %s1962_s19, 128  ;;  %s306_s7 = int_to_ptr.vmem [resolvable:$true] %s305_s7 }
  0x9f   : > { %p1442_p13 = scmp.ne.s32.totalorder %s1962_s19, %s1441_s29  ;;  %s1446_s25 = scalar_lea.hbm %s2106_s4, 512 }
  0xa0   : > { %p1447_p2 = scmp.lt.u32.totalorder %s1962_s19, %s2106_s4  ;;  %p1448_p10 = scmp.lt.u32.totalorder %s1446_s25, %s1441_s29 }
  0xa1   : > { %p1444_p12 = pnand %p1442_p13, %p1740_p7  ;;  %p1450_p8 = scmp.lt.u32.totalorder %s1441_s29, %s1962_s19 }
  0xa2   : > { %p1449_p3 = por %p1448_p10, %p1447_p2 }
  0xa3   : > { %p1445_p5 = pneg %p1444_p12 }
  0xa4   : > { %p1451_p11 = por %p1450_p8, %p1449_p3 }
  0xa6   : > { %p1452_p0 = pnand %p1451_p11, %p1445_p5 }
  0xa8   : > { %1455 = shalt.err (!%p1452_p0)
}
  0xa9   : > { %s1456_s9 = scalar_lea.vmem %s306_s7, 128  ;;  %s1609_s5 = smov [#allocation11]  }
  0xaa   : > { %p1457_p4 = scmp.ne.s32.totalorder %s306_s7, %s1456_s9  ;;  %s1461_s8 = sshll.u32 %s1609_s5, 4  ;;  %s1462_s8 = int_to_ptr.vmem [resolvable:$false] %s1461_s8 }
  0xab   : > { %s1463_s23 = scalar_lea.vmem %s1462_s8, 256  ;;  %p1464_p13 = scmp.lt.s32.totalorder %s306_s7, %s1462_s8 }
  0xac   : > { %p1459_p9 = pnand %p1457_p4, %p1740_p7  ;;  %p1465_p12 = scmp.lt.s32.totalorder %s1463_s23, %s1456_s9 }
  0xae   : > { %p1460_p6 = pneg %p1459_p9  ;;  %p1466_p1 = por %p1465_p12, %p1464_p13 }
  0xb0   : > { %p1467_p2 = pnand %p1466_p1, %p1460_p6 }
  0xb2   : > { %1470 = shalt.err (!%p1467_p2)
}
  0xb3   : > { %p2169_p10 = scmp.ne.s32.totalorder %s2142_s12, 0  ;;  %s2170_s18 = sld [smem:[#allocation22_spill]] }
  0xb5   : > { %1216 = dma.hbm_to_vmem [thread:$0]  (!%p2169_p10), %s1962_s19, 128, %s306_s7, %s1785_s14  }
  0xb9   : > { %p2171_p5 = scmp.ne.s32.totalorder %s2170_s18, 0 }
  0xba   : > { %s2172_s17 = sld [smem:[#allocation26_spill]] (!%p2171_p5)  ;;  %s1986_s24 = sand.u32 (!%p2171_p5), 1, %s1577_s22  }
  0xbb   : > { %314 = sbr.rel (%p2171_p5) target bundleno = 1284 (0x504), region = 40  ;;  %s1080_s1 = sshll.u32 (!%p2171_p5), %s1986_s24, 3 }
  0xbc   : > { %s317_s13 = scalar_lea.sflag (!%p2171_p5), [#allocation4], %s1986_s24  ;;  %s1990_s3 = scalar_lea.vmem (!%p2171_p5), [#allocation3], %s1080_s1 }
  0xc0   : > { %p2173_p7 = scmp.ne.s32.totalorder (!%p2171_p5), %s2172_s17, 0 }
  0xc2   : > { %1544 = dma.done.wait (%p2173_p7), %s317_s13, 128  }
  0xc3   : > { %1546 = vsyncadd (%p2173_p7), %s317_s13, 4294967168  ;;  %s2174_s12 = sld [smem:[#allocation23_spill]]  ;;  %s2175_s14 = sld [smem:[#allocation17_spill]] }
  0xc4   : > { %s2176_s19 = sld [smem:[#allocation27_spill]] }
  0xc9   : > { %s325_s27 = sand.u32 1, %s2174_s12   ;;  %s327_s7 = sand.u32 1, %s2175_s14  }
  0xca   : > { %s1081_s29 = sshll.u32 %s327_s7, 5  ;;  %s326_s30 = scalar_lea.sflag [#allocation7], %s325_s27 }
  0xcb   : > { %s329_s15 = scalar_lea.vmem [#allocation6], %s1081_s29  ;;  %p2177_p1 = scmp.ne.s32.totalorder %s2176_s19, 0 }
  0xcd   : > { %1548 = dma.done.wait (%p2177_p1), %s326_s30, 1024  }
  0xce   : > { %1550 = vsyncadd (%p2177_p1), %s326_s30, 4294966272  ;;  %s338_s25 = scalar_lea.vmem [#allocation8], %s1081_s29  ;;  %s344_s6 = scalar_lea.sflag [#allocation10], %s325_s27 }
  0xcf   : > { %s2002_s16 = scalar_lea.vmem [#allocation9], %s1081_s29 }
  0xd0   : > { %1552 = dma.done.wait (%p2177_p1), %s344_s6, 640  }
  0xd1   : > { %1554 = vsyncadd (%p2177_p1), %s344_s6, 4294966656  ;;  %s2008_s9 = sshll.u32 %s327_s7, 3  ;;  %s2011_s8 = scalar_lea.vmem [#allocation12], %s1080_s1 }
  0xd2   : > { %s356_s5 = scalar_lea.vmem [#allocation11], %s2008_s9  ;;  %s2178_s23 = sld [smem:[#allocation19_spill]] }
  0xd8   : > { %p1086_p3 = scmp.ne.s32.totalorder %s2178_s23, 0 }
  0xd9   : > { %vm407_vm0 = vcmask (!%p1086_p3), 261120   ;;  %v1610_v0 = vmov (!%p1086_p3), 0.0  }
  0xda   : > { %406 = sbr.rel (%p1086_p3) target bundleno = 225 (0xe1), region = 64  ;;  %408 = vst.msk [vmem:[#allocation2] sm:$0xff] (!%p1086_p3), %vm407_vm0, %v1610_v0 }
  0xe1 PF: > { %v414_v1 = vld [vmem:[%s338_s25] sm:$0xff]  ;;  %v415_v2 = vld [vmem:[%s338_s25 + $0x8] sm:$0xff]  ;;  %v1611_v4 = vmov 0.0|0.0   ;;  %v416_v7 = vld [vmem:[%s338_s25 + $0x10] sm:$0xff]  ;;  %vm1612_vm1 = vmmov 0   ;;  %v1613_v12 = vmov 0.0  }
  0xe2   : > { %v410_v3 = vld [vmem:[%s329_s15] sm:$0xff]  ;;  %1177 = vmatprep.subr.bf16.mxu1 %v1611_v4  ;;  %1171 = vmatprep.subr.bf16.mxu0 %v1611_v4  ;;  %v1178_v5 = vpack.c.bf16 %v415_v2, %v414_v1  ;;  %v411_v6 = vld [vmem:[%s329_s15 + $0x8] sm:$0xff]  ;;  %v417_v8 = vld [vmem:[%s338_s25 + $0x18] sm:$0xff]  ;;  %vm422_vm2 = vcmask 261120   ;;  %vm637_vm3 = vcmask 64512   ;;  %s2179_s18 = sld [smem:[#allocation19_spill]] }
  0xe3   : > { %v1172_v9 = vpack.c.bf16 %v411_v6, %v410_v3  ;;  %v412_v10 = vld [vmem:[%s329_s15 + $0x10] sm:$0xff]  ;;  %v413_v11 = vld [vmem:[%s329_s15 + $0x18] sm:$0xff]  ;;  %1142 = vmatprep.mubr.msk.f32.mxu1 %vm1612_vm1, %v1613_v12  ;;  %1131 = vmatprep.mubr.msk.f32.mxu0 %vm1612_vm1, %v1613_v12  ;;  %v1181_v13 = vpack.c.bf16 %v417_v8, %v416_v7  ;;  %v418_v16 = vld [vmem:[%s2002_s16] sm:$0xff] }
  0xe4   : > { %1179 = vmatpush3.bf16.msra.mxu1 %v1178_v5  ;;  %v1175_v14 = vpack.c.bf16 %v413_v11, %v412_v10  ;;  %v409_v15 = vld [vmem:[%s1990_s3] sm:$0xff]  ;;  %v419_v17 = vld [vmem:[%s2002_s16 + $0x8] sm:$0xff] }
  0xe5   : > { %1173 = vmatpush3.bf16.msra.mxu0 %v1172_v9  ;;  %1180 = vmatprep.subr.bf16.mxu1 %v1611_v4  ;;  %v420_v18 = vld [vmem:[%s2002_s16 + $0x10] sm:$0xff]  ;;  %v1184_v19 = vpack.c.bf16 %v419_v17, %v418_v16  ;;  %v421_v20 = vld [vmem:[%s2002_s16 + $0x18] sm:$0xff]  ;;  %v798_v37 = vld [vmem:[%s356_s5] sm:$0xff] }
  0xe6   : > { %1174 = vmatprep.subr.bf16.mxu0 %v1611_v4  ;;  %v1187_v21 = vpack.c.bf16 %v421_v20, %v420_v18  ;;  %v799_v43 = vld [vmem:[#allocation2] sm:$0xff] }
  0xe8   : > { %1182 = vmatpush3.bf16.msra.mxu1 %v1181_v13  ;;  %p1094_p8 = scmp.ne.s32.totalorder %s2179_s18, 3 }
  0xe9   : > { %1176 = vmatpush3.bf16.msra.mxu0 %v1175_v14  ;;  %1156 = vmatprep.subr.mxu1 %v1613_v12 }
  0xea   : > { %1183 = vmatprep.subr.bf16.mxu0 %v1611_v4 }
  0xeb   : > { %1143 = vmatmul.mubr.msk.f32.vlgmr.msra.gmra.mrb[0].mxu1 %vm422_vm2, %v409_v15 }
  0xec   : > { %1132 = vmatmul.mubr.msk.f32.vlgmr.msra.gmra.mrb[0].mxu0 %vm422_vm2, %v409_v15  ;;  %1158 = vmatprep.mubr.msk.f32.mxu1 %vm1612_vm1, %v1613_v12 }
  0xed   : > { %1153 = vmatprep.mubr.msk.f32.mxu0 %vm1612_vm1, %v1613_v12  ;;  %1185 = vmatpush3.bf16.msra.mxu0 %v1184_v19 }
  0xee   : > { %1186 = vmatprep.subr.bf16.mxu0 %v1611_v4 }
  0xf1   : > { %1188 = vmatpush3.bf16.msra.mxu0 %v1187_v21 }
  0xf2   : > { %1166 = vmatprep.subr.mxu0 %v1613_v12 }
  0xf4   : > { %1154 = vmatmul.mubr.msk.f32.vlgmr.msra.gmra.mrb[2].mxu0 %vm422_vm2, %v409_v15 }
  0xf5   : > { %1168 = vmatprep.mubr.msk.f32.mxu0 %vm1612_vm1, %v1613_v12  ;;  %1167 = vmatpush3.msra.mxu0 %v798_v37 }
 0x1be   : > { %v563_v22 = vpop.f32.mrb[0].mxu1 }
 0x1bf   : > { %v492_v23 = vpop.f32.mrb[0].mxu0  ;;  %v1144_v24 = vpop.f32.mrb[1].mxu1  ;;  %1157 = vmatpush3.xpose.msk.msra.mxu1 %vm637_vm3, %v563_v22 }
 0x1c0   : > { %v496_v25 = vmul.f32 0.35355338, %v492_v23  ;;  %v1133_v26 = vpop.f32.mrb[1].mxu0  ;;  %1161 = vmatprep.subr.mxu1 %v1613_v12 }
 0x1c2   : > { %1159 = vmatmul.mubr.msk.f32.vlgmr.msra.gmra.mrb[2].mxu1 %vm637_vm3, %v496_v25 }
 0x1c3   : > { %1163 = vmatprep.mubr.msk.f32.mxu1 %vm1612_vm1, %v1613_v12 }
 0x1c7   : > { %v633_v30 = vpop.f32.mrb[2].mxu0 }
 0x1c8   : > { %v1155_v31 = vpop.f32.mrb[3].mxu0  ;;  %1162 = vmatpush3.msra.mxu1 %v633_v30 }
 0x295   : > { %v710_v27 = vpop.f32.mrb[2].mxu1 }
 0x296   : > { %v1160_v28 = vpop.f32.mrb[3].mxu1  ;;  %v714_v29 = vsel %vm637_vm3, %v710_v27, -inf }
 0x297   : > { %715 = vmax.xlane.f32.xlu0 %v714_v29 }
 0x324   : > { %v716_v32 = vpop.xlane.xlu0 %715 }
 0x325   : > { %v717_v33 = vsub.f32 %v710_v27, %v716_v32 }
 0x327   : > { %v718_v34 = vmul.f32 1.442695, %v717_v33 }
 0x329   : > { %1317 = vpow2.f32 %v718_v34 }
 0x333   : > { %v1318_v35 = vpop.eup %1317 }
 0x334   : > { %1164 = vmatmul.mubr.msk.f32.vlgmr.msra.gmra.mrb[4].mxu1 %vm637_vm3, %v1318_v35  ;;  %v720_v36 = vsel %vm637_vm3, %v1318_v35, 0.0 }
 0x335   : > { %721 = vadd.xlane.f32.xlu0 %v720_v36 }
 0x3c2   : > { %v722_v38 = vpop.xlane.xlu0 %721 }
 0x3c3   : > { %1319 = vrcp.f32 %v722_v38 }
 0x3cd   : > { %v1320_v39 = vpop.eup %1319 }
 0x407   : > { %v792_v40 = vpop.f32.mrb[4].mxu1 }
 0x408   : > { %v797_v41 = vmul.f32 %v1320_v39, %v792_v40  ;;  %v1165_v42 = vpop.f32.mrb[5].mxu1 }
 0x40a   : > { %1169 = vmatmul.mubr.msk.f32.vlgmr.msra.gmra.mrb[4].mxu0 %vm637_vm3, %v797_v41 }
 0x4da   : > { %878 = sbr.rel (%p1094_p8) target bundleno = 1257 (0x4e9), region = 68 }
 0x4dd   : > { %v869_v44 = vpop.f32.mrb[4].mxu0 }
 0x4de   : > { %v873_v45 = vadd.f32 %v869_v44, %v799_v43  ;;  %v1170_v46 = vpop.f32.mrb[5].mxu0 }
 0x4e0   : > { %874 = vst.msk [vmem:[#allocation2] sm:$0xff] %vm422_vm2, %v873_v45 }
 0x4e7   : > { %v879_v47 = vld [vmem:[#allocation2] sm:$0xff] }
 0x4e8   : > { %880 = vst.msk [vmem:[%s2011_s8] sm:$0xff] %vm422_vm2, %v879_v47 }
 0x4e9 PF: > { %s2180_s17 = sld [smem:[#allocation20_spill]]  ;;  %s2181_s12 = sld [smem:[#allocation32_spill]] }
 0x4ea   : > { %s895_s19 = sshll.u32 %s2011_s8, 4  ;;  %s882_s27 = scalar_lea.sflag [#allocation5], %s1986_s24  ;;  %s896_s19 = int_to_ptr.vmem [resolvable:$true] %s895_s19 }
 0x4eb   : > { %s1471_s7 = scalar_lea.vmem %s896_s19, 128  ;;  %p2182_p0 = scmp.ne.s32.totalorder %s2163_s10, 0 }
 0x4ec   : > { %p1472_p11 = scmp.ne.s32.totalorder %s896_s19, %s1471_s7  ;;  %s1614_s29 = smov [#allocation12]  }
 0x4ed   : > { %s1475_s30 = sshll.u32 %s1614_s29, 4  ;;  %s1476_s30 = int_to_ptr.vmem [resolvable:$false] %s1475_s30 }
 0x4ee   : > { %p1473_p4 = pnand %p1472_p11, %p2182_p0  ;;  %s1477_s15 = scalar_lea.vmem %s1476_s30, 256 }
 0x4ef   : > { %s1096_s1 = sshll.u32 %s2180_s17, 7  ;;  %p1478_p6 = scmp.lt.s32.totalorder %s896_s19, %s1476_s30 }
 0x4f0   : > { %s2044_s14 = scalar_lea.hbm %s2181_s12, %s1096_s1  ;;  %p1474_p9 = pneg %p1473_p4 }
 0x4f1   : > { %p1479_p13 = scmp.lt.s32.totalorder %s1477_s15, %s1471_s7 }
 0x4f3   : > { %p1480_p12 = por %p1479_p13, %p1478_p6 }
 0x4f5   : > { %p1481_p2 = pnand %p1480_p12, %p1474_p9 }
 0x4f7   : > { %1484 = shalt.err (!%p1481_p2)
}
 0x4f8   : > { %s1485_s24 = scalar_lea.hbm %s2044_s14, 128  ;;  %s1489_s16 = scalar_lea.hbm %s2181_s12, 256 }
 0x4f9   : > { %p1486_p10 = scmp.ne.s32.totalorder %s2044_s14, %s1485_s24  ;;  %p1490_p1 = scmp.lt.u32.totalorder %s2044_s14, %s2181_s12 }
 0x4fa   : > { %p1491_p3 = scmp.lt.u32.totalorder %s1489_s16, %s1485_s24  ;;  %p1493_p11 = scmp.lt.u32.totalorder %s1485_s24, %s2044_s14 }
 0x4fb   : > { %p1487_p5 = pnand %p1486_p10, %p2182_p0 }
 0x4fc   : > { %p1492_p8 = por %p1491_p3, %p1490_p1 }
 0x4fd   : > { %p1488_p7 = pneg %p1487_p5 }
 0x4fe   : > { %p1494_p4 = por %p1493_p11, %p1492_p8 }
 0x500   : > { %p1495_p9 = pnand %p1494_p4, %p1488_p7 }
 0x502   : > { %1498 = shalt.err (!%p1495_p9)
}
 0x503   : > { %1199 = dma.vmem_to_hbm [thread:$0]  (%p2182_p0), %s896_s19, 128, %s2044_s14, %s882_s27  }
 0x504 PF: > { %p1222_p6 = scmp.ge.s32.totalorder %s1601_s28, 2  ;;  %s907_s8 = sand.u32 1, %s1573_s21  }
 0x505   : > { %p2183_p13 = scmp.ne.s32.totalorder %s2164_s11, 0  ;;  %s908_s23 = scalar_lea.sflag [#allocation5], %s907_s8 }
 0x507   : > { %p1218_p12 = pnand %p1222_p6, %p2183_p13 }
 0x509   : > { %1556 = dma.done.wait (!%p1218_p12), %s908_s23, 128  }
 0x50a   : > { %1558 = vsyncadd (!%p1218_p12), %s908_s23, 4294967168  ;;  %s27_s28 = sadd.s32 1, %s1601_s28   ;;  %s2184_s18 = sld [smem:[#allocation17_spill]] }
 0x50b   : > { %p24_p2 = scmp.ge.s32.totalorder %s27_s28, 10   ;;  %s2185_s17 = sld [smem:[#allocation28_spill]] }
 0x50c   : > { %s2186_s10 = sld [smem:[#allocation18_spill]]  ;;  %s2187_s23 = sld [smem:[#allocation29_spill]] }
 0x50d   : > { %s2188_s25 = sld [smem:[#allocation21_spill]]  ;;  %s2189_s1 = sld [smem:[#allocation24_spill]] }
 0x50e   : > { %s2190_s27 = sld [smem:[#allocation25_spill]]  ;;  %s2191_s19 = smov %s1569_s20 }
 0x50f   : > { %s2193_s21 = smov %s1577_s22  ;;  %s2195_s24 = smov %s1593_s26 }
 0x510   :  { %26 = sbr.rel (!%p24_p2) target bundleno = 17 (0x11), region = 141 }
 0x511   : > { %s2192_s20 = smov %s2185_s17 }
 0x512   : > { %s2194_s22 = smov %s2186_s10 }
 0x513   : > { %s2196_s26 = smov %s2189_s1 }
 0x517   :  { %913 = vsyncpa [#allocation4], 1 }
 0x518   :  { %915 = vsyncpa [#allocation4 + $0x1], 1 }
 0x519   :  { %916 = vsyncpa [#allocation7], 1 }
 0x51a   :  { %918 = vsyncpa [#allocation7 + $0x1], 1 }
 0x51b   :  { %919 = vsyncpa [#allocation10], 1 }
 0x51c   :  { %921 = vsyncpa [#allocation10 + $0x1], 1 }
 0x51d   :  { %922 = vsyncpa [#allocation5], 1 }
 0x51e   :  { %924 = vsyncpa [#allocation5 + $0x1], 1 }

</bundles_post_ra>
